<compile_context>
chip_gen: v5e
topology: v5e:2x2
jax: 0.10.0
libtpu: 0.0.40
codegen_flags: <defaults>
</compile_context>

<pallas_src>
import jax
import jax.numpy as jnp
from jax.experimental import pallas as pl
from jax.experimental.pallas import tpu as pltpu


def _adv_loss_kernel(x1_ref, x2_ref, w1_ref, b1_ref, w2_ref, b2_ref, out_ref):
    """Fused forward for both feature maps.

    x1_ref : (N, D_in)  VMEM  -- feat_map1
    x2_ref : (N, D_in)  VMEM  -- feat_map2
    w1_ref : (D_in, H)  VMEM  -- layer-1 weight
    b1_ref : (1, H)     VMEM  -- layer-1 bias
    w2_ref : (1, H)     VMEM  -- layer-2 weight (row form)
    b2_ref : (1, 1)     SMEM  -- layer-2 bias (scalar)
    out_ref: (1, 1)     SMEM  -- scalar loss
    """
    n = x1_ref.shape[0]
    w1 = w1_ref[...]
    b1 = b1_ref[...]            # (1, H), broadcast over rows
    w2 = w2_ref[...]            # (1, H)
    b2 = b2_ref[0, 0]           # scalar from SMEM

    def logits(x):
        # Layer 1: MXU matmul + bias, LeakyReLU(0.2) as a single max.
        h = jnp.dot(x, w1, preferred_element_type=jnp.float32) + b1
        h = jnp.maximum(h, 0.2 * h)
        # Layer 2: 1-wide output -> VPU multiply + XLU lane reduce (off the MXU).
        return jnp.sum(h * w2, axis=-1, keepdims=True) + b2        # (N, 1)

    s1 = logits(x1_ref[...])    # target = 1  -> BCE-with-logits = softplus(-s1)
    s2 = logits(x2_ref[...])    # target = 0  -> BCE-with-logits = softplus(+s2)

    def softplus(z):
        return jnp.maximum(z, 0.0) + jnp.log1p(jnp.exp(-jnp.abs(z)))

    # loss = mean(softplus(-s1)) + mean(softplus(s2))
    total = jnp.sum(softplus(-s1)) + jnp.sum(softplus(s2))
    out_ref[0, 0] = total * (1.0 / n)


@jax.jit
def adv_loss_forward(feat_map1, feat_map2, w1, b1, w2, b2):
    n, d_in = feat_map1.shape
    h_dim = w1.shape[1]

    # Cheap metadata-only reshapes (no concat / transpose, no HBM duplication).
    b1_row = b1.reshape(1, h_dim)
    w2_row = w2.reshape(1, h_dim)        # (H,1)->(1,H): contiguous, free
    b2_s = b2.reshape(1, 1)

    f32 = 4
    cost = pl.CostEstimate(
        flops=2 * (2 * n) * d_in * h_dim + 2 * (2 * n) * h_dim,
        transcendentals=2 * (2 * n),
        bytes_accessed=(2 * n * d_in + d_in * h_dim + 2 * h_dim + 1) * f32 + f32,
    )

    out = pl.pallas_call(
        _adv_loss_kernel,
        out_shape=jax.ShapeDtypeStruct((1, 1), jnp.float32),
        in_specs=[
            pl.BlockSpec(memory_space=pltpu.MemorySpace.VMEM),   # feat_map1
            pl.BlockSpec(memory_space=pltpu.MemorySpace.VMEM),   # feat_map2
            pl.BlockSpec(memory_space=pltpu.MemorySpace.VMEM),   # w1
            pl.BlockSpec(memory_space=pltpu.MemorySpace.VMEM),   # b1
            pl.BlockSpec(memory_space=pltpu.MemorySpace.VMEM),   # w2 (row)
            pl.BlockSpec(memory_space=pltpu.MemorySpace.SMEM),   # b2 scalar
        ],
        out_specs=pl.BlockSpec(memory_space=pltpu.MemorySpace.SMEM),
        cost_estimate=cost,
    )(feat_map1, feat_map2, w1, b1_row, w2_row, b2_s)
    return out[0, 0]


def _reference(feat_map1, feat_map2, w1, b1, w2, b2):
    """Pure-JAX reference (sigmoid discriminator + BCE, written in stable form)."""
    def disc_logits(x):
        h = x @ w1 + b1
        h = jnp.where(h > 0.0, h, 0.2 * h)
        return h @ w2 + b2

    s1 = disc_logits(feat_map1)
    s2 = disc_logits(feat_map2)
    loss1 = jnp.mean(jax.nn.softplus(-s1))   # BCE(sigmoid(s1), 1)
    loss2 = jnp.mean(jax.nn.softplus(s2))    # BCE(sigmoid(s2), 0)
    return loss1 + loss2


if __name__ == "__main__":
    # args.batch_size = 9  ->  Discriminator input dim = batch_size - 1 = 8
    B = 9
    D_IN = B - 1          # 8
    H = 32                # discriminator hidden width
    N = 4                 # number of feature vectors fed to the discriminator

    key = jax.random.PRNGKey(0)
    k1, k2, k3, k4 = jax.random.split(key, 4)

    feat_map1 = jax.random.normal(k1, (N, D_IN), dtype=jnp.float32)
    feat_map2 = jax.random.normal(k2, (N, D_IN), dtype=jnp.float32)

    # Deterministic parameter init (synthetic discriminator weights).
    w1 = jax.random.normal(k3, (D_IN, H), dtype=jnp.float32) * 0.1
    b1 = jnp.zeros((1, H), dtype=jnp.float32)
    w2 = jax.random.normal(k4, (H, 1), dtype=jnp.float32) * 0.1
    b2 = jnp.zeros((1, 1), dtype=jnp.float32)

    loss = adv_loss_forward(feat_map1, feat_map2, w1, b1, w2, b2)
    jax.block_until_ready(loss)

    ref = _reference(feat_map1, feat_map2, w1, b1, w2, b2)
    assert jnp.allclose(loss, ref, rtol=1e-5, atol=1e-5), (loss, ref)

    print("KERNEL_OK")
</pallas_src>

<mosaic_0001>
module attributes {stable_mosaic.version = 11 : i64} {
  func.func @_adv_loss_kernel(%arg0: memref<4x8xf32, #tpu.memory_space<vmem>>, %arg1: memref<4x8xf32, #tpu.memory_space<vmem>>, %arg2: memref<8x32xf32, #tpu.memory_space<vmem>>, %arg3: memref<1x32xf32, #tpu.memory_space<vmem>>, %arg4: memref<1x32xf32, #tpu.memory_space<vmem>>, %arg5: memref<1x1xf32, #tpu.memory_space<smem>>, %arg6: memref<1x1xf32, #tpu.memory_space<smem>>) attributes {dimension_semantics = [], scalar_prefetch = 0 : i64, scratch_operands = 0 : i64, tpu.core_type = #tpu.core_type<tc>} {
    %c0 = arith.constant 0 : index
    %c0_0 = arith.constant 0 : index
    %0 = vector.load %arg2[%c0, %c0_0] : memref<8x32xf32, #tpu.memory_space<vmem>>, vector<8x32xf32>
    %c0_1 = arith.constant 0 : index
    %c0_2 = arith.constant 0 : index
    %1 = vector.load %arg3[%c0_1, %c0_2] : memref<1x32xf32, #tpu.memory_space<vmem>>, vector<1x32xf32>
    %c0_3 = arith.constant 0 : index
    %c0_4 = arith.constant 0 : index
    %2 = vector.load %arg4[%c0_3, %c0_4] : memref<1x32xf32, #tpu.memory_space<vmem>>, vector<1x32xf32>
    %c0_5 = arith.constant 0 : index
    %c0_6 = arith.constant 0 : index
    %3 = memref.load %arg5[%c0_5, %c0_6] : memref<1x1xf32, #tpu.memory_space<smem>>
    %c0_7 = arith.constant 0 : index
    %c0_8 = arith.constant 0 : index
    %4 = vector.load %arg0[%c0_7, %c0_8] : memref<4x8xf32, #tpu.memory_space<vmem>>, vector<4x8xf32>
    %cst = arith.constant dense<0.000000e+00> : vector<4x32xf32>
    %5 = tpu.matmul %4, %0, %cst {dimension_numbers = #tpu.dot_dimension_numbers<[1], [0], [0], [1], [0, 0, 1, 1], [], []>} : vector<4x8xf32>, vector<8x32xf32>, vector<4x32xf32> -> vector<4x32xf32>
    %6 = vector.broadcast %1 : vector<1x32xf32> to vector<4x32xf32>
    %7 = arith.addf %5, %6 : vector<4x32xf32>
    %cst_9 = arith.constant 2.000000e-01 : f32
    %8 = vector.broadcast %cst_9 : f32 to vector<4x32xf32>
    %9 = arith.mulf %8, %7 : vector<4x32xf32>
    %10 = arith.maximumf %7, %9 : vector<4x32xf32>
    %11 = vector.broadcast %2 : vector<1x32xf32> to vector<4x32xf32>
    %12 = arith.mulf %10, %11 : vector<4x32xf32>
    %cst_10 = arith.constant dense<0.000000e+00> : vector<4xf32>
    %13 = vector.multi_reduction <add>, %12, %cst_10 [1] : vector<4x32xf32> to vector<4xf32>
    %14 = vector.shape_cast %13 : vector<4xf32> to vector<4x1xf32>
    %15 = vector.broadcast %3 : f32 to vector<4x1xf32>
    %16 = arith.addf %14, %15 : vector<4x1xf32>
    %c0_11 = arith.constant 0 : index
    %c0_12 = arith.constant 0 : index
    %17 = vector.load %arg1[%c0_11, %c0_12] : memref<4x8xf32, #tpu.memory_space<vmem>>, vector<4x8xf32>
    %cst_13 = arith.constant dense<0.000000e+00> : vector<4x32xf32>
    %18 = tpu.matmul %17, %0, %cst_13 {dimension_numbers = #tpu.dot_dimension_numbers<[1], [0], [0], [1], [0, 0, 1, 1], [], []>} : vector<4x8xf32>, vector<8x32xf32>, vector<4x32xf32> -> vector<4x32xf32>
    %19 = vector.broadcast %1 : vector<1x32xf32> to vector<4x32xf32>
    %20 = arith.addf %18, %19 : vector<4x32xf32>
    %cst_14 = arith.constant 2.000000e-01 : f32
    %21 = vector.broadcast %cst_14 : f32 to vector<4x32xf32>
    %22 = arith.mulf %21, %20 : vector<4x32xf32>
    %23 = arith.maximumf %20, %22 : vector<4x32xf32>
    %24 = vector.broadcast %2 : vector<1x32xf32> to vector<4x32xf32>
    %25 = arith.mulf %23, %24 : vector<4x32xf32>
    %cst_15 = arith.constant dense<0.000000e+00> : vector<4xf32>
    %26 = vector.multi_reduction <add>, %25, %cst_15 [1] : vector<4x32xf32> to vector<4xf32>
    %27 = vector.shape_cast %26 : vector<4xf32> to vector<4x1xf32>
    %28 = vector.broadcast %3 : f32 to vector<4x1xf32>
    %29 = arith.addf %27, %28 : vector<4x1xf32>
    %cst_16 = arith.constant 0.000000e+00 : f32
    %30 = vector.broadcast %cst_16 : f32 to vector<4x1xf32>
    %31 = arith.subf %30, %16 : vector<4x1xf32>
    %cst_17 = arith.constant 0.000000e+00 : f32
    %32 = vector.broadcast %cst_17 : f32 to vector<4x1xf32>
    %33 = arith.maximumf %31, %32 : vector<4x1xf32>
    %34 = math.absf %31 : vector<4x1xf32>
    %cst_18 = arith.constant 0.000000e+00 : f32
    %35 = vector.broadcast %cst_18 : f32 to vector<4x1xf32>
    %36 = arith.subf %35, %34 : vector<4x1xf32>
    %37 = math.exp %36 : vector<4x1xf32>
    %38 = math.log1p %37 : vector<4x1xf32>
    %39 = arith.addf %33, %38 : vector<4x1xf32>
    %40 = vector.shape_cast %39 : vector<4x1xf32> to vector<1x4x1xf32>
    %cst_19 = arith.constant dense<0.000000e+00> : vector<1xf32>
    %41 = vector.multi_reduction <add>, %40, %cst_19 [1, 2] : vector<1x4x1xf32> to vector<1xf32>
    %42 = vector.shape_cast %41 : vector<1xf32> to vector<1x1x1xf32>
    %43 = vector.extract %42[0, 0, 0] : f32 from vector<1x1x1xf32>
    %cst_20 = arith.constant 0.000000e+00 : f32
    %44 = vector.broadcast %cst_20 : f32 to vector<4x1xf32>
    %45 = arith.maximumf %29, %44 : vector<4x1xf32>
    %46 = math.absf %29 : vector<4x1xf32>
    %cst_21 = arith.constant 0.000000e+00 : f32
    %47 = vector.broadcast %cst_21 : f32 to vector<4x1xf32>
    %48 = arith.subf %47, %46 : vector<4x1xf32>
    %49 = math.exp %48 : vector<4x1xf32>
    %50 = math.log1p %49 : vector<4x1xf32>
    %51 = arith.addf %45, %50 : vector<4x1xf32>
    %52 = vector.shape_cast %51 : vector<4x1xf32> to vector<1x4x1xf32>
    %cst_22 = arith.constant dense<0.000000e+00> : vector<1xf32>
    %53 = vector.multi_reduction <add>, %52, %cst_22 [1, 2] : vector<1x4x1xf32> to vector<1xf32>
    %54 = vector.shape_cast %53 : vector<1xf32> to vector<1x1x1xf32>
    %55 = vector.extract %54[0, 0, 0] : f32 from vector<1x1x1xf32>
    %56 = arith.addf %43, %55 : f32
    %cst_23 = arith.constant 2.500000e-01 : f32
    %57 = arith.mulf %56, %cst_23 : f32
    %c0_24 = arith.constant 0 : index
    %c0_25 = arith.constant 0 : index
    %58 = memref.load %arg6[%c0_24, %c0_25] : memref<1x1xf32, #tpu.memory_space<smem>>
    memref.store %57, %arg6[%c0_24, %c0_25] : memref<1x1xf32, #tpu.memory_space<smem>>
    return
  }
}

</mosaic_0001>

<bundles_post_ra>
// kernel: adv_loss_forward.1
= control target key start
LH: loop header
LB: loop body
LE: loop exit
PB: predicated region body
PF: predicated region fallthrough
CT: control target
= control target key end

     0   :  { %12 = vsyncpa [#allocation4], 0  ;;  %s384_s0 = inlined_call_operand.hbm [shape: f32[4,8], index: 0, kind: input, shape index: {}]   ;;  %s385_s1 = inlined_call_operand.hbm [shape: f32[4,8], index: 1, kind: input, shape index: {}]   ;;  %s386_s2 = inlined_call_operand.hbm [shape: f32[8,32], index: 2, kind: input, shape index: {}]   ;;  %s387_s3 = inlined_call_operand.vmem [shape: f32[1,32], index: 3, kind: input, shape index: {}]   ;;  %s388_s4 = inlined_call_operand.vmem [shape: f32[1,32], index: 4, kind: input, shape index: {}]   ;;  %s389_s5 = inlined_call_operand.<no memory space> [shape: f32[1,1], index: 5, kind: input, shape index: {}]   ;;  %s390_s6 = inlined_call_operand.hbm [shape: f32[1,1], index: 6, kind: output, shape index: {}]  }
   0x1   :  { %13 = vsyncpa [#allocation7], 0  ;;  %s31_s23 = sshll.u32 %s385_s1, 4  ;;  %s32_s23 = int_to_ptr.hbm [resolvable:$true] %s31_s23 }
   0x2   :  { %14 = vsyncpa [#allocation5], 0  ;;  %s324_s24 = smov [#allocation6]   ;;  %s20_s28 = sshll.u32 %s384_s0, 4  ;;  %s21_s28 = int_to_ptr.hbm [resolvable:$true] %s20_s28 }
   0x3   :  { %s33_s25 = sshll.u32 %s324_s24, 4  ;;  %s325_s29 = smov [#allocation3]   ;;  %s34_s25 = int_to_ptr.vmem [resolvable:$true] %s33_s25 }
   0x4   :  { %36 = dma.hbm_to_vmem [thread:$0]  %s32_s23, 64, %s34_s25, [#allocation7]  }
   0x5   :  { %s22_s30 = sshll.u32 %s325_s29, 4  ;;  %s42_s9 = sshll.u32 %s386_s2, 4  ;;  %s23_s30 = int_to_ptr.vmem [resolvable:$true] %s22_s30  ;;  %s43_s9 = int_to_ptr.hbm [resolvable:$true] %s42_s9 }
   0x6   :  { %25 = dma.hbm_to_vmem [thread:$0]  %s21_s28, 64, %s23_s30, [#allocation4]  }
   0x7   :  { %s326_s1 = smov [#allocation8]  }
   0x8   :  { %s44_s10 = sshll.u32 %s326_s1, 4  ;;  %s45_s10 = int_to_ptr.vmem [resolvable:$true] %s44_s10 }
   0x9   :  { %47 = dma.hbm_to_vmem [thread:$0]  %s43_s9, 128, %s45_s10, [#allocation7]  }
   0xa   :  { %318 = dma.done.wait [#allocation4], 64  }
   0xb   :  { %319 = vsyncadd [#allocation4], 4294967232 }
   0xc   :  { %320 = dma.done.wait [#allocation7], 192  }
   0xd   :  { %321 = vsyncadd [#allocation7], 4294967104  ;;  %vm74_vm0 = vcmask 64512   ;;  %v66_v0 = vld [vmem:[#allocation8] sm:$0xff]  ;;  %v70_v1 = vld [vmem:[#allocation3] sm:$0xf]  ;;  %v108_v17 = vstv %s389_s5 }
   0xe   :  { %v110_v2 = vld [vmem:[#allocation6] sm:$0xf]  ;;  %93 = vmatpush.msra.mxu0 %v66_v0  ;;  %129 = vmatpush.msra.mxu1 %v66_v0  ;;  %v224_v3 = vld [vmem:[%s387_s3] ss:$0 sm:$0xff]  ;;  %vm104_vm1 = vcmask 257024   ;;  %vm157_vm3 = vcmask 3072  }
   0xf   :  { %214 = vmatmul.msk.f32.vlgmr.msra.gmra.mxu0 %vm74_vm0, %v70_v1  ;;  %215 = vmatmul.msk.f32.vlgmr.msra.gmra.mxu1 %vm74_vm0, %v110_v2  ;;  %v225_v10 = vld [vmem:[%s388_s4] ss:$0 sm:$0xff]  ;;  %s202_s15 = sshll.u32 %s390_s6, 4  ;;  %s327_s19 = smov [#allocation9]   ;;  %s203_s15 = int_to_ptr.hbm [resolvable:$true] %s202_s15 }
  0x8c   :  { %v95_v4 = vpop.f32.mrf.mxu0  ;;  %v131_v5 = vpop.f32.mrf.mxu1 }
  0x8d   :  { %v96_v6 = vadd.f32 %v224_v3, %v95_v4  ;;  %v132_v7 = vadd.f32 %v224_v3, %v131_v5 }
  0x8f   :  { %v98_v8 = vmul.f32 0.2, %v96_v6  ;;  %v134_v9 = vmul.f32 0.2, %v132_v7 }
  0x91   :  { %v99_v11 = vmax.f32 %v96_v6, %v98_v8  ;;  %v135_v12 = vmax.f32 %v132_v7, %v134_v9 }
  0x93   :  { %v103_v13 = vmul.f32 %v225_v10, %v99_v11  ;;  %v136_v15 = vmul.f32 %v225_v10, %v135_v12 }
  0x95   :  { %v105_v14 = vsel %vm104_vm1, %v103_v13, 0.0  ;;  %v137_v16 = vsel %vm104_vm1, %v136_v15, 0.0 }
  0x96   :  { %106 = vadd.xlane.f32.xlu0 %v105_v14 }
  0x9e   :  { %138 = vadd.xlane.f32.xlu0 %v137_v16 }
 0x109   :  { %v107_v18 = vpop.xlane.xlu0 %106 }
 0x10a   :  { %v109_v19 = vadd.f32 %v108_v17, %v107_v18 }
 0x10c   :  { %v141_v20 = vsub.f32 0.0, %v109_v19 }
 0x10e   :  { %v143_v21 = vand.u32 2147483647, %v141_v20  ;;  %v142_v40 = vmax.f32 %v141_v20, 0.0 }
 0x110   :  { %v144_v22 = vsub.f32 0.0, %v143_v21 }
 0x111   :  { %v139_v23 = vpop.xlane.xlu0 %138 }
 0x112   :  { %v145_v24 = vmul.f32 1.442695, %v144_v22  ;;  %v140_v25 = vadd.f32 %v139_v23, %v108_v17 }
 0x114   :  { %226 = vpow2.f32 %v145_v24  ;;  %v169_v26 = vand.u32 2147483647, %v140_v25  ;;  %v168_v49 = vmax.f32 %v140_v25, 0.0 }
 0x116   :  { %v170_v27 = vsub.f32 0.0, %v169_v26 }
 0x118   :  { %v171_v28 = vmul.f32 1.442695, %v170_v27 }
 0x11a   :  { %v227_v29 = vpop.eup %226  ;;  %228 = vpow2.f32 %v171_v28 }
 0x11b   :  { %v147_v30 = vadd.f32 1.0, %v227_v29  ;;  %v150_v31 = vmul.f32 -0.5, %v227_v29  ;;  %v153_v34 = vand.u32 2147483647, %v227_v29 }
 0x11d   :  { %230 = vlog2.f32 %v147_v30  ;;  %v151_v33 = vadd.f32 1.0, %v150_v31  ;;  %vm154_vm2 = vcmp.lt.f32.partialorder %v153_v34, 0.0004427343 }
 0x11f   :  { %v152_v39 = vmul.f32 %v227_v29, %v151_v33 }
 0x120   :  { %v229_v32 = vpop.eup %228 }
 0x121   :  { %v173_v35 = vadd.f32 1.0, %v229_v32  ;;  %v176_v36 = vmul.f32 -0.5, %v229_v32  ;;  %v179_v44 = vand.u32 2147483647, %v229_v32 }
 0x123   :  { %v231_v37 = vpop.eup %230  ;;  %232 = vlog2.f32 %v173_v35  ;;  %v177_v42 = vadd.f32 1.0, %v176_v36  ;;  %vm180_vm4 = vcmp.lt.f32.partialorder %v179_v44, 0.0004427343 }
 0x124   :  { %v149_v38 = vmul.f32 0.6931472, %v231_v37 }
 0x125   :  { %v178_v48 = vmul.f32 %v229_v32, %v177_v42 }
 0x126   :  { %v155_v41 = vsel %vm154_vm2, %v152_v39, %v149_v38 }
 0x127   :  { %v156_v43 = vadd.f32 %v155_v41, %v142_v40 }
 0x129   :  { %v233_v45 = vpop.eup %232  ;;  %v158_v46 = vsel %vm157_vm3, %v156_v43, 0.0 }
 0x12a   :  { %159 = vadd.xlane.f32.xlu1 %v158_v46  ;;  %v175_v47 = vmul.f32 0.6931472, %v233_v45 }
 0x12c   :  { %v181_v50 = vsel %vm180_vm4, %v178_v48, %v175_v47 }
 0x12d   :  { %v182_v51 = vadd.f32 %v181_v50, %v168_v49 }
 0x12f   :  { %v183_v52 = vsel %vm157_vm3, %v182_v51, 0.0 }
 0x132   :  { %184 = vadd.xlane.f32.xlu1 %v183_v52 }
 0x19d   :  { %v160_v53 = vpop.xlane.xlu1 %159 }
 0x19e   :  { %v161_v54 = vrot.slane %v160_v53, 4 }
 0x1a0   :  { %v162_v55 = vadd.f32 %v161_v54, %v160_v53 }
 0x1a2   :  { %v163_v56 = vrot.slane %v162_v55, 2 }
 0x1a4   :  { %v164_v57 = vadd.f32 %v163_v56, %v162_v55 }
 0x1a5   :  { %v185_v58 = vpop.xlane.xlu1 %184 }
 0x1a6   :  { %v186_v59 = vrot.slane %v185_v58, 4  ;;  %v165_v60 = vrot.slane %v164_v57, 1 }
 0x1a8   :  { %v187_v61 = vadd.f32 %v186_v59, %v185_v58  ;;  %v166_v62 = vadd.f32 %v165_v60, %v164_v57 }
 0x1aa   :  { %v188_v63 = vrot.slane %v187_v61, 2  ;;  %216 = vpush %v166_v62 }
 0x1ac   :  { %v189_v0 = vadd.f32 %v188_v63, %v187_v61 }
 0x1ae   :  { %v190_v1 = vrot.slane %v189_v0, 1 }
 0x1b0   :  { %v191_v2 = vadd.f32 %v190_v1, %v189_v0 }
 0x1b2   :  { %218 = vpush %v191_v2 }
 0x1db   :  { %s217_s4 = spop %216 }
 0x1e3   :  { %s219_s16 = spop %218 }
 0x1e4   :  { %s193_s17 = sadd.f32 %s219_s16, %s217_s4 }
 0x1e6   :  { %s194_s18 = smul.f32 0.25, %s193_s17 }
 0x1e8   :  { %196 = sst [smem:[#allocation9]] %s194_s18 }
 0x1e9   :  { %205 = dma.smem_to_hbm %s327_s19, 16, %s203_s15, [#allocation5]  }
 0x1ea   :  { %322 = dma.done.wait [#allocation5], 16  }
 0x1eb   :  { %323 = vsyncadd [#allocation5], 4294967280 }
 0x1ec   :  { %210 = sfence }
 0x1ed   :  { %211 = vsyncpa [#allocation4], 1 }
 0x1ee   :  { %212 = vsyncpa [#allocation7], 1 }
 0x1ef   :  { %213 = vsyncpa [#allocation5], 1 }

</bundles_post_ra>
